<compile_context>
chip_gen: v6e
topology: v6e:2x2x1
jax: 0.10.0
libtpu: 0.0.40
codegen_flags: <defaults>
</compile_context>

<pallas_src>
import functools

import jax
import jax.numpy as jnp
from jax.experimental import pallas as pl
from jax.experimental.pallas import tpu as pltpu


def fold_bn(gamma, beta, running_mean, running_var, eps=1e-5):
    """Eval-mode BatchNorm -> per-channel (scale, bias)."""
    scale = gamma / jnp.sqrt(running_var + eps)
    bias = beta - running_mean * scale
    return scale.astype(jnp.float32), bias.astype(jnp.float32)


def _band_weight_matrix(w_hwio, width):
    """(3, 3, Cin, Cout) HWIO -> (3*width*Cin, width*Cout) block-banded matrix.

    Row  s*width*Cin + w_in*Cin + ci, column w_out*Cout + co holds
    K[s, (w_in - w_out) + 1, ci, co] when |w_in - w_out| <= 1, else 0.
    Multiplying a lane-dense activation slab (rows, width*Cin) that has been
    vertically shifted by dy = s - 1 therefore implements the 3x3 "SAME" conv
    exactly (dx taps and horizontal zero padding are folded into the weights).
    """
    kh, kw, cin, cout = w_hwio.shape
    assert (kh, kw) == (3, 3)
    w_in = jnp.arange(width)[:, None]
    w_out = jnp.arange(width)[None, :]
    dx = w_in - w_out                                        # (W, W)
    valid = (jnp.abs(dx) <= 1).astype(w_hwio.dtype)
    kx = jnp.clip(dx + 1, 0, 2)                              # (W, W) x-tap index
    slabs = []
    for ky in range(3):                                      # dy = -1, 0, +1
        blocks = w_hwio[ky][kx]                              # (W, W, cin, cout)
        blocks = blocks * valid[:, :, None, None]
        slab = jnp.transpose(blocks, (0, 2, 1, 3)).reshape(width * cin, width * cout)
        slabs.append(slab)
    return jnp.concatenate(slabs, axis=0)                    # (3*W*Cin, W*Cout)


def _basic_block_kernel(x_ref, w1_ref, b1_ref, w2_ref, b2_ref, o_ref, *,
                        rows_per_image, imgs_per_block):
    """conv3x3 -> BN -> ReLU -> conv3x3 -> BN -> +x -> ReLU for one batch block.

    x_ref  : (Bt*H, W*C)   bf16 lane-dense activations (also the residual)
    w*_ref : (3*W*C, W*C)  bf16 block-banded conv weights (BN scale folded in)
    b*_ref : (1, W*C)      f32 tiled BN bias rows
    o_ref  : (Bt*H, W*C)   lane-dense output slab
    """
    x16 = x_ref[...]
    rows, lanes = x16.shape
    x32 = x16.astype(jnp.float32)                            # residual / shift math in f32

    def vertical_band(f):
        # f: (rows, lanes) f32.  Returns bf16 (rows, 3*lanes): the dy = -1, 0, +1
        # row-shifted copies side by side (128-aligned lane concat), with zero
        # rows at every image's top/bottom border.
        zrow = jnp.zeros((1, lanes), f.dtype)
        up = jnp.concatenate([zrow, f[:rows - 1]], axis=0)   # row r <- f[r-1]
        down = jnp.concatenate([f[1:], zrow], axis=0)        # row r <- f[r+1]
        if imgs_per_block > 1:
            # Zero the rows that crossed an image boundary inside the block.
            r = jax.lax.broadcasted_iota(jnp.int32, f.shape, 0)
            up = jnp.where(r % rows_per_image == 0, 0.0, up)
            down = jnp.where(r % rows_per_image == rows_per_image - 1, 0.0, down)
        return jnp.concatenate([up, f, down], axis=-1).astype(jnp.bfloat16)

    # ---- conv1 (BN1 scale folded into weights): one MXU matmul, f32 acc ----
    acc1 = jnp.dot(vertical_band(x32), w1_ref[...],
                   preferred_element_type=jnp.float32)       # (rows, W*C)
    hid = jnp.maximum(acc1 + b1_ref[...], 0.0)               # BN1 bias + ReLU (f32)

    # ---- conv2 (BN2 scale folded) on the bf16-cast intermediate ----
    acc2 = jnp.dot(vertical_band(hid), w2_ref[...],
                   preferred_element_type=jnp.float32)       # (rows, W*C)
    out = acc2 + b2_ref[...] + x32                           # BN2 bias + residual
    o_ref[...] = jnp.maximum(out, 0.0).astype(o_ref.dtype)   # final ReLU, lane-dense store


@jax.jit
def basic_block_forward(x_nchw, w1_hwio, bn1, w2_hwio, bn2):
    """x_nchw: (B, C, H, W) as in PyTorch; returns (B, C, H, W)."""
    x = jnp.transpose(x_nchw, (0, 2, 3, 1))                  # NCHW -> NHWC
    B, H, W, Cin = x.shape
    C = w1_hwio.shape[-1]
    assert Cin == C, "no downsample: residual add requires inplanes == planes"
    lanes = W * C

    # Fold BN scales into the conv weights (per output channel); biases stay.
    s1, b1 = fold_bn(*bn1)
    s2, b2 = fold_bn(*bn2)
    w1f = w1_hwio.astype(jnp.float32) * s1
    w2f = w2_hwio.astype(jnp.float32) * s2

    # Block-banded bf16 weight matrices and tiled f32 bias rows.
    a1 = _band_weight_matrix(w1f, W).astype(jnp.bfloat16)    # (3*W*C, W*C)
    a2 = _band_weight_matrix(w2f, W).astype(jnp.bfloat16)
    bias1 = jnp.tile(b1, W).reshape(1, lanes)                # (1, W*C) f32
    bias2 = jnp.tile(b2, W).reshape(1, lanes)

    # Lane-dense bf16 activation slab: rows = batch*height, lanes = W*C.
    x_slab = x.reshape(B * H, lanes).astype(jnp.bfloat16)

    # Batch merge: fewest grid steps that still double-buffer (v5e/v6e) and
    # feed both v7x TensorCores (>= 2 "parallel" steps when possible).
    imgs_per_block = B // 2 if (B % 2 == 0 and B >= 2) else 1
    if (imgs_per_block * H) % 8 != 0:
        imgs_per_block = B                                   # full-array block is always legal
    block_rows = imgs_per_block * H
    grid = (B // imgs_per_block,)

    kernel = functools.partial(_basic_block_kernel,
                               rows_per_image=H,
                               imgs_per_block=imgs_per_block)

    flops = 2 * 2 * (B * H) * (3 * lanes) * lanes            # two banded matmuls
    bytes_accessed = (x_slab.size * 2                        # bf16 input slab
                      + B * H * lanes * x_nchw.dtype.itemsize  # output
                      + (a1.size + a2.size) * 2              # bf16 weights
                      + (bias1.size + bias2.size) * 4)       # f32 biases

    out_slab = pl.pallas_call(
        kernel,
        out_shape=jax.ShapeDtypeStruct((B * H, lanes), x_nchw.dtype),
        grid_spec=pltpu.PrefetchScalarGridSpec(
            num_scalar_prefetch=0,
            grid=grid,
            in_specs=[
                pl.BlockSpec((block_rows, lanes), lambda b: (b, 0)),
                pl.BlockSpec((3 * lanes, lanes), lambda b: (0, 0)),
                pl.BlockSpec((1, lanes), lambda b: (0, 0)),
                pl.BlockSpec((3 * lanes, lanes), lambda b: (0, 0)),
                pl.BlockSpec((1, lanes), lambda b: (0, 0)),
            ],
            out_specs=pl.BlockSpec((block_rows, lanes), lambda b: (b, 0)),
        ),
        compiler_params=pltpu.CompilerParams(
            dimension_semantics=("parallel",)),
        cost_estimate=pl.CostEstimate(flops=flops, transcendentals=0,
                                      bytes_accessed=bytes_accessed),
    )(x_slab, a1, bias1, a2, bias2)

    out = out_slab.reshape(B, H, W, C)
    return jnp.transpose(out, (0, 3, 1, 2))                  # NHWC -> NCHW


def reference_forward(x_nchw, w1_hwio, bn1, w2_hwio, bn2):
    """Pure-JAX f32 reference (lax conv) for correctness checking."""
    x = jnp.transpose(x_nchw, (0, 2, 3, 1))
    dn = ('NHWC', 'HWIO', 'NHWC')
    s1, b1 = fold_bn(*bn1)
    s2, b2 = fold_bn(*bn2)
    o = jax.lax.conv_general_dilated(x, w1_hwio, (1, 1), 'SAME',
                                     dimension_numbers=dn)
    o = jnp.maximum(o * s1 + b1, 0.0)
    o = jax.lax.conv_general_dilated(o, w2_hwio, (1, 1), 'SAME',
                                     dimension_numbers=dn)
    o = o * s2 + b2 + x
    o = jnp.maximum(o, 0.0)
    return jnp.transpose(o, (0, 3, 1, 2))


if __name__ == "__main__":
    # Small shapes consistent with BasicBlock(inplanes=planes=8, stride=1).
    # W * C = 128 keeps the activation slab exactly lane-dense; B = 4 exercises
    # the batch-merged path (2 images per grid step, 2 parallel grid steps).
    B, C, H, W = 4, 8, 16, 16
    key = jax.random.PRNGKey(0)
    k = jax.random.split(key, 9)

    x = jax.random.normal(k[0], (B, C, H, W), jnp.float32)

    # Conv weights (HWIO), scaled roughly like PyTorch kaiming init.
    fan_in = 3 * 3 * C
    w1 = jax.random.normal(k[1], (3, 3, C, C), jnp.float32) * (2.0 / fan_in) ** 0.5
    w2 = jax.random.normal(k[2], (3, 3, C, C), jnp.float32) * (2.0 / fan_in) ** 0.5

    # BatchNorm params (eval mode): gamma, beta, running_mean, running_var.
    bn1 = (1.0 + 0.1 * jax.random.normal(k[3], (C,), jnp.float32),
           0.1 * jax.random.normal(k[4], (C,), jnp.float32),
           0.1 * jax.random.normal(k[5], (C,), jnp.float32),
           1.0 + 0.1 * jax.random.uniform(k[6], (C,), jnp.float32))
    bn2 = (1.0 + 0.1 * jax.random.normal(k[7], (C,), jnp.float32),
           0.1 * jax.random.normal(k[8], (C,), jnp.float32),
           jnp.zeros((C,), jnp.float32),
           jnp.ones((C,), jnp.float32))

    out = basic_block_forward(x, w1, bn1, w2, bn2)
    out = jax.block_until_ready(out)

    ref = reference_forward(x, w1, bn1, w2, bn2)
    assert out.shape == (B, C, H, W)
    max_err = float(jnp.max(jnp.abs(out - ref)))
    mean_err = float(jnp.mean(jnp.abs(out - ref)))
    # bf16 MXU operands (f32 accumulation) vs. the pure-f32 reference.
    assert max_err < 8e-2 and mean_err < 1.5e-2, (max_err, mean_err)

    print("KERNEL_OK")
</pallas_src>

<mosaic_0001>
module attributes {stable_mosaic.version = 11 : i64} {
  func.func @_basic_block_kernel(%arg0: i32, %arg1: memref<32x128xbf16, #tpu.memory_space<vmem>>, %arg2: memref<384x128xbf16, #tpu.memory_space<vmem>>, %arg3: memref<1x128xf32, #tpu.memory_space<vmem>>, %arg4: memref<384x128xbf16, #tpu.memory_space<vmem>>, %arg5: memref<1x128xf32, #tpu.memory_space<vmem>>, %arg6: memref<32x128xf32, #tpu.memory_space<vmem>>) attributes {dimension_semantics = [#tpu.dimension_semantics<parallel>], iteration_bounds = array<i64: 2>, scalar_prefetch = 0 : i64, scratch_operands = 0 : i64, tpu.core_type = #tpu.core_type<tc>, window_params = [{transform_indices = @transform_0, window_bounds = array<i64: 32, 128>}, {pipeline_mode = #tpu.pipeline_mode<synchronous>, transform_indices = @transform_1, window_bounds = array<i64: 384, 128>}, {pipeline_mode = #tpu.pipeline_mode<synchronous>, transform_indices = @transform_2, window_bounds = array<i64: 1, 128>}, {pipeline_mode = #tpu.pipeline_mode<synchronous>, transform_indices = @transform_3, window_bounds = array<i64: 384, 128>}, {pipeline_mode = #tpu.pipeline_mode<synchronous>, transform_indices = @transform_4, window_bounds = array<i64: 1, 128>}, {transform_indices = @transform_5, window_bounds = array<i64: 32, 128>}]} {
    %c0 = arith.constant 0 : index
    %c0_0 = arith.constant 0 : index
    %0 = vector.load %arg1[%c0, %c0_0] : memref<32x128xbf16, #tpu.memory_space<vmem>>, vector<32x128xbf16>
    %1 = arith.extf %0 : vector<32x128xbf16> to vector<32x128xf32>
    %cst = arith.constant 0.000000e+00 : f32
    %2 = vector.broadcast %cst : f32 to vector<1x128xf32>
    %3 = vector.extract_strided_slice %1 {offsets = [0, 0], sizes = [31, 128], strides = [1, 1]} : vector<32x128xf32> to vector<31x128xf32>
    %4 = tpu.concatenate %2, %3 in 0 : vector<1x128xf32>, vector<31x128xf32> -> vector<32x128xf32>
    %5 = vector.extract_strided_slice %1 {offsets = [1, 0], sizes = [31, 128], strides = [1, 1]} : vector<32x128xf32> to vector<31x128xf32>
    %6 = tpu.concatenate %5, %2 in 0 : vector<31x128xf32>, vector<1x128xf32> -> vector<32x128xf32>
    %7 = tpu.iota {dimensions = array<i32: 0>} : vector<32x128xi32>
    %c16_i32 = arith.constant 16 : i32
    %c0_i32 = arith.constant 0 : i32
    %8 = arith.cmpi eq, %c16_i32, %c0_i32 : i32
    %c1_i32 = arith.constant 1 : i32
    %9 = arith.select %8, %c1_i32, %c16_i32 : i32
    %10 = vector.broadcast %9 : i32 to vector<32x128xi32>
    %11 = arith.remsi %7, %10 : vector<32x128xi32>
    %c0_i32_1 = arith.constant 0 : i32
    %12 = vector.broadcast %c0_i32_1 : i32 to vector<32x128xi32>
    %13 = arith.cmpi ne, %11, %12 : vector<32x128xi32>
    %c0_i32_2 = arith.constant 0 : i32
    %14 = vector.broadcast %c0_i32_2 : i32 to vector<32x128xi32>
    %15 = arith.cmpi slt, %11, %14 : vector<32x128xi32>
    %c0_i32_3 = arith.constant 0 : i32
    %16 = arith.cmpi slt, %9, %c0_i32_3 : i32
    %17 = vector.broadcast %16 : i1 to vector<32x128xi1>
    %18 = vector.broadcast %17 : vector<32x128xi1> to vector<32x128xi1>
    %19 = arith.xori %15, %18 : vector<32x128xi1>
    %20 = arith.andi %19, %13 : vector<32x128xi1>
    %21 = vector.broadcast %9 : i32 to vector<32x128xi32>
    %22 = arith.addi %11, %21 : vector<32x128xi32>
    %23 = arith.select %20, %22, %11 : vector<32x128xi1>, vector<32x128xi32>
    %c0_i32_4 = arith.constant 0 : i32
    %24 = vector.broadcast %c0_i32_4 : i32 to vector<32x128xi32>
    %25 = arith.cmpi eq, %23, %24 : vector<32x128xi32>
    %cst_5 = arith.constant 0.000000e+00 : f32
    %26 = vector.broadcast %cst_5 : f32 to vector<32x128xf32>
    %27 = arith.select %25, %26, %4 : vector<32x128xi1>, vector<32x128xf32>
    %c16_i32_6 = arith.constant 16 : i32
    %c0_i32_7 = arith.constant 0 : i32
    %28 = arith.cmpi eq, %c16_i32_6, %c0_i32_7 : i32
    %c1_i32_8 = arith.constant 1 : i32
    %29 = arith.select %28, %c1_i32_8, %c16_i32_6 : i32
    %30 = vector.broadcast %29 : i32 to vector<32x128xi32>
    %31 = arith.remsi %7, %30 : vector<32x128xi32>
    %c0_i32_9 = arith.constant 0 : i32
    %32 = vector.broadcast %c0_i32_9 : i32 to vector<32x128xi32>
    %33 = arith.cmpi ne, %31, %32 : vector<32x128xi32>
    %c0_i32_10 = arith.constant 0 : i32
    %34 = vector.broadcast %c0_i32_10 : i32 to vector<32x128xi32>
    %35 = arith.cmpi slt, %31, %34 : vector<32x128xi32>
    %c0_i32_11 = arith.constant 0 : i32
    %36 = arith.cmpi slt, %29, %c0_i32_11 : i32
    %37 = vector.broadcast %36 : i1 to vector<32x128xi1>
    %38 = vector.broadcast %37 : vector<32x128xi1> to vector<32x128xi1>
    %39 = arith.xori %35, %38 : vector<32x128xi1>
    %40 = arith.andi %39, %33 : vector<32x128xi1>
    %41 = vector.broadcast %29 : i32 to vector<32x128xi32>
    %42 = arith.addi %31, %41 : vector<32x128xi32>
    %43 = arith.select %40, %42, %31 : vector<32x128xi1>, vector<32x128xi32>
    %c15_i32 = arith.constant 15 : i32
    %44 = vector.broadcast %c15_i32 : i32 to vector<32x128xi32>
    %45 = arith.cmpi eq, %43, %44 : vector<32x128xi32>
    %cst_12 = arith.constant 0.000000e+00 : f32
    %46 = vector.broadcast %cst_12 : f32 to vector<32x128xf32>
    %47 = arith.select %45, %46, %6 : vector<32x128xi1>, vector<32x128xf32>
    %48 = tpu.concatenate %27, %1, %47 in 1 : vector<32x128xf32>, vector<32x128xf32>, vector<32x128xf32> -> vector<32x384xf32>
    %49 = arith.truncf %48 : vector<32x384xf32> to vector<32x384xbf16>
    %c0_13 = arith.constant 0 : index
    %c0_14 = arith.constant 0 : index
    %50 = vector.load %arg2[%c0_13, %c0_14] : memref<384x128xbf16, #tpu.memory_space<vmem>>, vector<384x128xbf16>
    %cst_15 = arith.constant dense<0.000000e+00> : vector<32x128xf32>
    %51 = tpu.matmul %49, %50, %cst_15 {dimension_numbers = #tpu.dot_dimension_numbers<[1], [0], [0], [1], [0, 0, 1, 1], [], []>} : vector<32x384xbf16>, vector<384x128xbf16>, vector<32x128xf32> -> vector<32x128xf32>
    %c0_16 = arith.constant 0 : index
    %c0_17 = arith.constant 0 : index
    %52 = vector.load %arg3[%c0_16, %c0_17] : memref<1x128xf32, #tpu.memory_space<vmem>>, vector<1x128xf32>
    %53 = vector.broadcast %52 : vector<1x128xf32> to vector<32x128xf32>
    %54 = arith.addf %51, %53 : vector<32x128xf32>
    %cst_18 = arith.constant 0.000000e+00 : f32
    %55 = vector.broadcast %cst_18 : f32 to vector<32x128xf32>
    %56 = arith.maximumf %54, %55 : vector<32x128xf32>
    %cst_19 = arith.constant 0.000000e+00 : f32
    %57 = vector.broadcast %cst_19 : f32 to vector<1x128xf32>
    %58 = vector.extract_strided_slice %56 {offsets = [0, 0], sizes = [31, 128], strides = [1, 1]} : vector<32x128xf32> to vector<31x128xf32>
    %59 = tpu.concatenate %57, %58 in 0 : vector<1x128xf32>, vector<31x128xf32> -> vector<32x128xf32>
    %60 = vector.extract_strided_slice %56 {offsets = [1, 0], sizes = [31, 128], strides = [1, 1]} : vector<32x128xf32> to vector<31x128xf32>
    %61 = tpu.concatenate %60, %57 in 0 : vector<31x128xf32>, vector<1x128xf32> -> vector<32x128xf32>
    %62 = tpu.iota {dimensions = array<i32: 0>} : vector<32x128xi32>
    %c16_i32_20 = arith.constant 16 : i32
    %c0_i32_21 = arith.constant 0 : i32
    %63 = arith.cmpi eq, %c16_i32_20, %c0_i32_21 : i32
    %c1_i32_22 = arith.constant 1 : i32
    %64 = arith.select %63, %c1_i32_22, %c16_i32_20 : i32
    %65 = vector.broadcast %64 : i32 to vector<32x128xi32>
    %66 = arith.remsi %62, %65 : vector<32x128xi32>
    %c0_i32_23 = arith.constant 0 : i32
    %67 = vector.broadcast %c0_i32_23 : i32 to vector<32x128xi32>
    %68 = arith.cmpi ne, %66, %67 : vector<32x128xi32>
    %c0_i32_24 = arith.constant 0 : i32
    %69 = vector.broadcast %c0_i32_24 : i32 to vector<32x128xi32>
    %70 = arith.cmpi slt, %66, %69 : vector<32x128xi32>
    %c0_i32_25 = arith.constant 0 : i32
    %71 = arith.cmpi slt, %64, %c0_i32_25 : i32
    %72 = vector.broadcast %71 : i1 to vector<32x128xi1>
    %73 = vector.broadcast %72 : vector<32x128xi1> to vector<32x128xi1>
    %74 = arith.xori %70, %73 : vector<32x128xi1>
    %75 = arith.andi %74, %68 : vector<32x128xi1>
    %76 = vector.broadcast %64 : i32 to vector<32x128xi32>
    %77 = arith.addi %66, %76 : vector<32x128xi32>
    %78 = arith.select %75, %77, %66 : vector<32x128xi1>, vector<32x128xi32>
    %c0_i32_26 = arith.constant 0 : i32
    %79 = vector.broadcast %c0_i32_26 : i32 to vector<32x128xi32>
    %80 = arith.cmpi eq, %78, %79 : vector<32x128xi32>
    %cst_27 = arith.constant 0.000000e+00 : f32
    %81 = vector.broadcast %cst_27 : f32 to vector<32x128xf32>
    %82 = arith.select %80, %81, %59 : vector<32x128xi1>, vector<32x128xf32>
    %c16_i32_28 = arith.constant 16 : i32
    %c0_i32_29 = arith.constant 0 : i32
    %83 = arith.cmpi eq, %c16_i32_28, %c0_i32_29 : i32
    %c1_i32_30 = arith.constant 1 : i32
    %84 = arith.select %83, %c1_i32_30, %c16_i32_28 : i32
    %85 = vector.broadcast %84 : i32 to vector<32x128xi32>
    %86 = arith.remsi %62, %85 : vector<32x128xi32>
    %c0_i32_31 = arith.constant 0 : i32
    %87 = vector.broadcast %c0_i32_31 : i32 to vector<32x128xi32>
    %88 = arith.cmpi ne, %86, %87 : vector<32x128xi32>
    %c0_i32_32 = arith.constant 0 : i32
    %89 = vector.broadcast %c0_i32_32 : i32 to vector<32x128xi32>
    %90 = arith.cmpi slt, %86, %89 : vector<32x128xi32>
    %c0_i32_33 = arith.constant 0 : i32
    %91 = arith.cmpi slt, %84, %c0_i32_33 : i32
    %92 = vector.broadcast %91 : i1 to vector<32x128xi1>
    %93 = vector.broadcast %92 : vector<32x128xi1> to vector<32x128xi1>
    %94 = arith.xori %90, %93 : vector<32x128xi1>
    %95 = arith.andi %94, %88 : vector<32x128xi1>
    %96 = vector.broadcast %84 : i32 to vector<32x128xi32>
    %97 = arith.addi %86, %96 : vector<32x128xi32>
    %98 = arith.select %95, %97, %86 : vector<32x128xi1>, vector<32x128xi32>
    %c15_i32_34 = arith.constant 15 : i32
    %99 = vector.broadcast %c15_i32_34 : i32 to vector<32x128xi32>
    %100 = arith.cmpi eq, %98, %99 : vector<32x128xi32>
    %cst_35 = arith.constant 0.000000e+00 : f32
    %101 = vector.broadcast %cst_35 : f32 to vector<32x128xf32>
    %102 = arith.select %100, %101, %61 : vector<32x128xi1>, vector<32x128xf32>
    %103 = tpu.concatenate %82, %56, %102 in 1 : vector<32x128xf32>, vector<32x128xf32>, vector<32x128xf32> -> vector<32x384xf32>
    %104 = arith.truncf %103 : vector<32x384xf32> to vector<32x384xbf16>
    %c0_36 = arith.constant 0 : index
    %c0_37 = arith.constant 0 : index
    %105 = vector.load %arg4[%c0_36, %c0_37] : memref<384x128xbf16, #tpu.memory_space<vmem>>, vector<384x128xbf16>
    %cst_38 = arith.constant dense<0.000000e+00> : vector<32x128xf32>
    %106 = tpu.matmul %104, %105, %cst_38 {dimension_numbers = #tpu.dot_dimension_numbers<[1], [0], [0], [1], [0, 0, 1, 1], [], []>} : vector<32x384xbf16>, vector<384x128xbf16>, vector<32x128xf32> -> vector<32x128xf32>
    %c0_39 = arith.constant 0 : index
    %c0_40 = arith.constant 0 : index
    %107 = vector.load %arg5[%c0_39, %c0_40] : memref<1x128xf32, #tpu.memory_space<vmem>>, vector<1x128xf32>
    %108 = vector.broadcast %107 : vector<1x128xf32> to vector<32x128xf32>
    %109 = arith.addf %106, %108 : vector<32x128xf32>
    %110 = arith.addf %109, %1 : vector<32x128xf32>
    %cst_41 = arith.constant 0.000000e+00 : f32
    %111 = vector.broadcast %cst_41 : f32 to vector<32x128xf32>
    %112 = arith.maximumf %110, %111 : vector<32x128xf32>
    %c0_42 = arith.constant 0 : index
    %c0_43 = arith.constant 0 : index
    %113 = vector.load %arg6[%c0_42, %c0_43] : memref<32x128xf32, #tpu.memory_space<vmem>>, vector<32x128xf32>
    tpu.vector_store %arg6[%c0_42, %c0_43], %112 {strides = array<i32>} : memref<32x128xf32, #tpu.memory_space<vmem>>, vector<32x128xf32>,
    return
  }
  func.func @transform_0(%arg0: i32) -> (i32, i32) {
    %c0_i32 = arith.constant 0 : i32
    %c0_i32_0 = arith.constant 0 : i32
    return %arg0, %c0_i32 : i32, i32
  }
  func.func @transform_1(%arg0: i32) -> (i32, i32) {
    %c0_i32 = arith.constant 0 : i32
    %c0_i32_0 = arith.constant 0 : i32
    %c0_i32_1 = arith.constant 0 : i32
    return %c0_i32, %c0_i32_0 : i32, i32
  }
  func.func @transform_2(%arg0: i32) -> (i32, i32) {
    %c0_i32 = arith.constant 0 : i32
    %c0_i32_0 = arith.constant 0 : i32
    %c0_i32_1 = arith.constant 0 : i32
    return %c0_i32, %c0_i32_0 : i32, i32
  }
  func.func @transform_3(%arg0: i32) -> (i32, i32) {
    %c0_i32 = arith.constant 0 : i32
    %c0_i32_0 = arith.constant 0 : i32
    %c0_i32_1 = arith.constant 0 : i32
    return %c0_i32, %c0_i32_0 : i32, i32
  }
  func.func @transform_4(%arg0: i32) -> (i32, i32) {
    %c0_i32 = arith.constant 0 : i32
    %c0_i32_0 = arith.constant 0 : i32
    %c0_i32_1 = arith.constant 0 : i32
    return %c0_i32, %c0_i32_0 : i32, i32
  }
  func.func @transform_5(%arg0: i32) -> (i32, i32) {
    %c0_i32 = arith.constant 0 : i32
    %c0_i32_0 = arith.constant 0 : i32
    return %arg0, %c0_i32 : i32, i32
  }
}

</mosaic_0001>

<bundles_post_ra>
// kernel: tile.13
= control target key start
LH: loop header
LB: loop body
LE: loop exit
PB: predicated region body
PF: predicated region fallthrough
CT: control target
= control target key end

     0   :  { %s28_s0 = inlined_call_operand.vmem [shape: f32[8], index: 0, kind: input, shape index: {}]   ;;  %s29_s1 = inlined_call_operand.vmem [shape: f32[16,8], index: 1, kind: output, shape index: {}]  }
   0x1   :  { %v4_v0 = vld [vmem:[%s28_s0] ss:$0 sm:$0xff] }
   0x2   :  { %5 = vst [vmem:[%s29_s1] sm:$0xff] %v4_v0  ;;  %8 = vst [vmem:[%s29_s1 + $0x8] sm:$0xff] %v4_v0 }

// kernel: tile.14
= control target key start
LH: loop header
LB: loop body
LE: loop exit
PB: predicated region body
PF: predicated region fallthrough
CT: control target
= control target key end

     0   :  { %s133_s10 = smov 120   ;;  %s134_s11 = smov 104   ;;  %vm3_vm0 = vcmask 64512   ;;  %vm9_vm1 = vcmask 1048512   ;;  %vm15_vm2 = vcmask 982912   ;;  %vm21_vm3 = vcmask 917312   ;;  %s209_s0 = inlined_call_operand.vmem [shape: f32[16,8], index: 0, kind: input, shape index: {}]   ;;  %s210_s1 = inlined_call_operand.vmem [shape: f32[1,128], index: 1, kind: output, shape index: {}]  }
   0x1   :  { %v103_v0 = vld [vmem:[%s209_s0 + $0xf] sm:$0x1]   ;;  %v105_v1 = vld [vmem:[%s209_s0 + $0xd] sm:$0x1]   ;;  %v104_v2 = vld [vmem:[%s209_s0 + $0xe] sm:$0x1]  }
   0x2   :  { %7 = vrot.lane.b32.xlu0 %v103_v0, %s133_s10  ;;  %19 = vrot.lane.b32.xlu1 %v105_v1, %s134_s11  ;;  %v106_v3 = vld [vmem:[%s209_s0 + $0xc] sm:$0x1]   ;;  %s135_s16 = smov 112   ;;  %s136_s17 = smov 96   ;;  %v107_v4 = vld [vmem:[%s209_s0 + $0xb] sm:$0x1]  }
   0x3   :  { %v108_v5 = vld [vmem:[%s209_s0 + $0xa] sm:$0x1]   ;;  %v2_v6 = vld [vmem:[%s209_s0] sm:$0x1]   ;;  %s137_s24 = smov 88   ;;  %s138_s25 = smov 80  }
   0x4   :  { %4 = vst.msk [vmem:[#allocation0] sm:$0x1] %vm3_vm0, %v2_v6   ;;  %v109_v7 = vld [vmem:[%s209_s0 + $0x9] sm:$0x1]   ;;  %v110_v8 = vld [vmem:[%s209_s0 + $0x8] sm:$0x1]  }
   0x5   :  { %s139_s30 = smov 72   ;;  %s140_s2 = smov 64   ;;  %v111_v9 = vld [vmem:[%s209_s0 + $0x7] sm:$0x1]   ;;  %v112_v10 = vld [vmem:[%s209_s0 + $0x6] sm:$0x1]  }
   0x6   :  { %13 = vrot.lane.b32.xlu0 %v104_v2, %s135_s16  ;;  %25 = vrot.lane.b32.xlu1 %v106_v3, %s136_s17  ;;  %s141_s7 = smov 56   ;;  %s142_s8 = smov 48   ;;  %v113_v11 = vld [vmem:[%s209_s0 + $0x5] sm:$0x1]   ;;  %v114_v12 = vld [vmem:[%s209_s0 + $0x4] sm:$0x1]  }
   0x7   :  { %s143_s13 = smov 40   ;;  %s144_s14 = smov 32   ;;  %v115_v13 = vld [vmem:[%s209_s0 + $0x3] sm:$0x1]   ;;  %v116_v14 = vld [vmem:[%s209_s0 + $0x2] sm:$0x1]  }
   0x8   :  { %s145_s19 = smov 24   ;;  %s146_s20 = smov 16   ;;  %v117_v15 = vld [vmem:[%s209_s0 + $0x1] sm:$0x1]   ;;  %vm27_vm4 = vcmask 851712   ;;  %vm33_vm5 = vcmask 786112  }
   0x9   :  { %s147_s0 = smov 8   ;;  %vm39_vm6 = vcmask 720512   ;;  %vm45_vm7 = vcmask 654912   ;;  %vm51_vm8 = vcmask 589312   ;;  %vm57_vm9 = vcmask 523712  }
   0xa   :  { %31 = vrot.lane.b32.xlu0 %v107_v4, %s137_s24  ;;  %37 = vrot.lane.b32.xlu1 %v108_v5, %s138_s25  ;;  %vm63_vm10 = vcmask 458112   ;;  %vm69_vm11 = vcmask 392512   ;;  %vm75_vm12 = vcmask 326912   ;;  %vm81_vm13 = vcmask 261312  }
   0xb   :  { %vm87_vm14 = vcmask 195712   ;;  %vm93_vm15 = vcmask 130112  }
   0xe   :  { %43 = vrot.lane.b32.xlu0 %v109_v7, %s139_s30  ;;  %49 = vrot.lane.b32.xlu1 %v110_v8, %s140_s2 }
  0x12   :  { %55 = vrot.lane.b32.xlu0 %v111_v9, %s141_s7  ;;  %61 = vrot.lane.b32.xlu1 %v112_v10, %s142_s8 }
  0x16   :  { %67 = vrot.lane.b32.xlu0 %v113_v11, %s143_s13  ;;  %73 = vrot.lane.b32.xlu1 %v114_v12, %s144_s14 }
  0x1a   :  { %79 = vrot.lane.b32.xlu0 %v115_v13, %s145_s19  ;;  %85 = vrot.lane.b32.xlu1 %v116_v14, %s146_s20 }
  0x1e   :  { %91 = vrot.lane.b32.xlu0 %v117_v15, %s147_s0 }
  0x74   :  { %v8_v16 = vpop.permute.xlu0 %7   ;;  %v20_v17 = vpop.permute.xlu1 %19  }
  0x75   :  { %10 = vst.msk [vmem:[#allocation0] sm:$0x1] %vm9_vm1, %v8_v16  }
  0x78   :  { %v14_v18 = vpop.permute.xlu0 %13   ;;  %v26_v19 = vpop.permute.xlu1 %25  }
  0x79   :  { %16 = vst.msk [vmem:[#allocation0] sm:$0x1] %vm15_vm2, %v14_v18  }
  0x7a   :  { %22 = vst.msk [vmem:[#allocation0] sm:$0x1] %vm21_vm3, %v20_v17  }
  0x7b   :  { %28 = vst.msk [vmem:[#allocation0] sm:$0x1] %vm27_vm4, %v26_v19  }
  0x7c   :  { %v32_v20 = vpop.permute.xlu0 %31   ;;  %v38_v21 = vpop.permute.xlu1 %37  }
  0x7d   :  { %34 = vst.msk [vmem:[#allocation0] sm:$0x1] %vm33_vm5, %v32_v20  }
  0x7e   :  { %40 = vst.msk [vmem:[#allocation0] sm:$0x1] %vm39_vm6, %v38_v21  }
  0x80   :  { %v44_v22 = vpop.permute.xlu0 %43   ;;  %v50_v23 = vpop.permute.xlu1 %49  }
  0x81   :  { %46 = vst.msk [vmem:[#allocation0] sm:$0x1] %vm45_vm7, %v44_v22  }
  0x82   :  { %52 = vst.msk [vmem:[#allocation0] sm:$0x1] %vm51_vm8, %v50_v23  }
  0x84   :  { %v56_v24 = vpop.permute.xlu0 %55   ;;  %v62_v25 = vpop.permute.xlu1 %61  }
  0x85   :  { %58 = vst.msk [vmem:[#allocation0] sm:$0x1] %vm57_vm9, %v56_v24  }
  0x86   :  { %64 = vst.msk [vmem:[#allocation0] sm:$0x1] %vm63_vm10, %v62_v25  }
  0x88   :  { %v68_v26 = vpop.permute.xlu0 %67   ;;  %v74_v27 = vpop.permute.xlu1 %73  }
  0x89   :  { %70 = vst.msk [vmem:[#allocation0] sm:$0x1] %vm69_vm11, %v68_v26  }
  0x8a   :  { %76 = vst.msk [vmem:[#allocation0] sm:$0x1] %vm75_vm12, %v74_v27  }
  0x8c   :  { %v80_v28 = vpop.permute.xlu0 %79   ;;  %v86_v29 = vpop.permute.xlu1 %85  }
  0x8d   :  { %82 = vst.msk [vmem:[#allocation0] sm:$0x1] %vm81_vm13, %v80_v28  }
  0x8e   :  { %88 = vst.msk [vmem:[#allocation0] sm:$0x1] %vm87_vm14, %v86_v29  }
  0x90   :  { %v92_v30 = vpop.permute.xlu0 %91  }
  0x91   :  { %94 = vst.msk [vmem:[#allocation0] sm:$0x1] %vm93_vm15, %v92_v30  }
  0x98   :  { %v99_v31 = vld [vmem:[#allocation0] sm:$0x1] }
  0x99   :  { %102 = vst [vmem:[%s210_s1] sm:$0x1] %v99_v31 }

// kernel: basic_block_forward.1
= control target key start
LH: loop header
LB: loop body
LE: loop exit
PB: predicated region body
PF: predicated region fallthrough
CT: control target
= control target key end

     0   :  { %s1365_s18 = smov 0   ;;  %s1632_s0 = inlined_call_operand.vmem [shape: bf16[64,128], index: 0, kind: input, shape index: {}]   ;;  %s1633_s1 = inlined_call_operand.vmem [shape: bf16[384,128], index: 1, kind: input, shape index: {}]   ;;  %s1634_s2 = inlined_call_operand.vmem [shape: f32[1,128], index: 2, kind: input, shape index: {}]   ;;  %s1635_s3 = inlined_call_operand.vmem [shape: bf16[384,128], index: 3, kind: input, shape index: {}]   ;;  %s1636_s4 = inlined_call_operand.vmem [shape: f32[1,128], index: 4, kind: input, shape index: {}]   ;;  %s1637_s5 = inlined_call_operand.vmem [shape: f32[64,128], index: 5, kind: output, shape index: {}]  }
   0x1 LB: > { %s1050_s19 = sadd.s32 4294967295, %s1332_s18   ;;  %p1054_p0 = scmp.ge.s32.totalorder %s1332_s18, 1  ;;  %s1332_s18 = sphi %s1365_s18, %s15_s18  }
   0x2   : > { %p188_p1 = scmp.lt.s32.totalorder %s1332_s18, 3 }
   0x4   : > { %p189_p2 = pnand %p1054_p0, %p188_p1 }
   0x5   : > { %s1055_s9 = sshll.u32 (!%p189_p2), %s1050_s19, 2 }
   0x6   : > { %192 = sbr.rel (%p189_p2) target bundleno = 475 (0x1db), region = 40  ;;  %p217_p3 = scmp.lt.s32.totalorder (!%p189_p2), %s1055_s9, 7 }
   0xb   : > { %v1274_v0 = vld [vmem:[%s1633_s1 + $0x78] sm:$0xff]   ;;  %v1277_v3 = vld [vmem:[%s1633_s1 + $0x70] sm:$0xff]   ;;  %v1280_v6 = vld [vmem:[%s1633_s1 + $0x68] sm:$0xff]   ;;  %v267_v7 = vlaneseq  ;;  %s1655_s9 = smov (!%p217_p3, %s1055_s9), 7  ;;  %vm254_vm2 = vcmask 1046528   ;;  %vm241_vm3 = vcmask 1040384  }
   0xc   : > { %v1275_v1 = vld [vmem:[%s1633_s1 + $0xb8] sm:$0xff]   ;;  %1149 = vmatprep.subr.bf16.mxu0 %v1274_v0  ;;  %v1278_v4 = vld [vmem:[%s1633_s1 + $0xb0] sm:$0xff]   ;;  %v1281_v8 = vld [vmem:[%s1633_s1 + $0xa8] sm:$0xff]   ;;  %s1056_s6 = sshll.u32 %s1655_s9, 2  ;;  %vm1334_vm5 = vmmov 1   ;;  %s1058_s7 = sshll.u32 %s1655_s9, 3 }
   0xd   : > { %v1276_v2 = vld [vmem:[%s1633_s1 + $0x38] sm:$0xff]   ;;  %1225 = vmatprep.subr.bf16.mxu1 %v1275_v1  ;;  %v1279_v5 = vld [vmem:[%s1633_s1 + $0x30] sm:$0xff]   ;;  %v1282_v9 = vld [vmem:[%s1633_s1 + $0x28] sm:$0xff]   ;;  %v268_v12 = vshrl.u32 %v267_v7, 7  ;;  %s220_s16 = scalar_lea.vmem %s1632_s0, %s1056_s6  ;;  %s226_s11 = scalar_lea.vmem %s1637_s5, %s1058_s7 }
   0xe   : > { %1150 = vmatpush3.bf16.msra.mxu0 %v1276_v2  ;;  %1226 = vmatpush3.bf16.msra.mxu1 %v1275_v1  ;;  %v1283_v10 = vld [vmem:[%s1633_s1 + $0x60] sm:$0xff]   ;;  %v1286_v14 = vld [vmem:[%s1633_s1 + $0x58] sm:$0xff]   ;;  %v1289_v18 = vld [vmem:[%s1633_s1 + $0x50] sm:$0xff]  }
   0xf   : > { %1151 = vmatprep.subr.bf16.mxu0 %v1277_v3  ;;  %1227 = vmatprep.subr.bf16.mxu1 %v1278_v4  ;;  %v1284_v11 = vld [vmem:[%s1633_s1 + $0xa0] sm:$0xff]   ;;  %v1287_v15 = vld [vmem:[%s1633_s1 + $0x98] sm:$0xff]   ;;  %v269_v16 = vadd.s32 8, %v268_v12  ;;  %v1290_v19 = vld [vmem:[%s1633_s1 + $0x90] sm:$0xff]   ;;  %v271_v21 = vadd.s32 24, %v268_v12  ;;  %v276_v23 = vand.u32 15, %v268_v12 }
  0x10   : > { %v1285_v13 = vld [vmem:[%s1633_s1 + $0x20] sm:$0xff]   ;;  %v1288_v17 = vld [vmem:[%s1633_s1 + $0x18] sm:$0xff]   ;;  %v1291_v22 = vld [vmem:[%s1633_s1 + $0x10] sm:$0xff]   ;;  %v270_v25 = vadd.s32 16, %v268_v12 }
  0x11   : > { %v283_v20 = vand.u32 15, %v269_v16  ;;  %v1292_v24 = vld [vmem:[%s1633_s1 + $0x48] sm:$0xff]   ;;  %v297_v27 = vand.u32 15, %v271_v21  ;;  %v1295_v29 = vld [vmem:[%s1633_s1 + $0x40] sm:$0xff]   ;;  %vm1449_vm1 = vcmp.ne.s32.totalorder %v276_v23, 0  ;;  %v1300_v51 = vld [vmem:[%s1635_s3 + $0x78] sm:$0xff]  }
  0x12   : > { %1152 = vmatpush3.bf16.msra.mxu0 %v1279_v5  ;;  %1228 = vmatpush3.bf16.msra.mxu1 %v1278_v4  ;;  %v1293_v26 = vld [vmem:[%s1633_s1 + $0x88] sm:$0xff]   ;;  %v229_v30 = vld [vmem:[%s220_s16] sm:$0xff]   ;;  %v290_v34 = vand.u32 15, %v270_v25  ;;  %vm1486_vm7 = vmpackc.low %vm1334_vm5, %vm1449_vm1 }
  0x13   : > { %1153 = vmatprep.subr.bf16.mxu0 %v1280_v6  ;;  %1229 = vmatprep.subr.bf16.mxu1 %v1281_v8  ;;  %v1294_v28 = vld [vmem:[%s1633_s1 + $0x8] sm:$0xff]   ;;  %vm1445_vm0 = vcmp.ne.s32.totalorder %v283_v20, 15  ;;  %v1296_v35 = vld [vmem:[%s1633_s1 + $0x80] sm:$0xff]   ;;  %v1456_v36 = vunpack.c.l.bf16 %v229_v30  ;;  %v1458_v37 = vunpack.c.h.bf16 %v229_v30  ;;  %vm1464_vm4 = vcmp.ne.s32.totalorder %v297_v27, 15  ;;  %v1301_v60 = vld [vmem:[%s1635_s3 + $0x38] sm:$0xff]  }
  0x14   : > { %v231_v31 = vld [vmem:[%s220_s16 + $0x8] sm:$0xff]   ;;  %vm1475_vm6 = vmpackc.low %vm1445_vm0, %vm1334_vm5  ;;  %v1297_v46 = vld [vmem:[%s1633_s1] sm:$0xff]   ;;  %vm1491_vm8 = vcmp.ne.s32.totalorder %v290_v34, 0  ;;  %573 = vmatprep.mubr.bf16.mxu0 %v229_v30 }
  0x15   : > { %v1460_v38 = vunpack.c.l.bf16 %v231_v31  ;;  %v1462_v39 = vunpack.c.h.bf16 %v231_v31  ;;  %v242_v41 = vrot.slane %v1456_v36, 7  ;;  %v243_v42 = vrot.slane %v1458_v37, 7  ;;  %vm1504_vm9 = vmpackc.low %vm1464_vm4, %vm1334_vm5  ;;  %v1305_v2 = vld [vmem:[%s1635_s3 + $0xb8] sm:$0xff]   ;;  %v1302_v3 = vld [vmem:[%s1635_s3 + $0x70] sm:$0xff]  }
  0x16   : > { %1154 = vmatpush3.bf16.msra.mxu0 %v1282_v9  ;;  %1230 = vmatpush3.bf16.msra.mxu1 %v1281_v8  ;;  %v255_v43 = vrot.slane %v1456_v36, 1  ;;  %v256_v44 = vrot.slane %v1458_v37, 1  ;;  %vm1519_vm10 = vmpackc.low %vm1334_vm5, %vm1491_vm8  ;;  %v1303_v4 = vld [vmem:[%s1635_s3 + $0x30] sm:$0xff]   ;;  %v1304_v5 = vld [vmem:[%s1635_s3 + $0x68] sm:$0xff]  }
  0x17   : > { %1155 = vmatprep.subr.bf16.mxu0 %v1283_v10  ;;  %1231 = vmatprep.subr.bf16.mxu1 %v1284_v11  ;;  %v258_v47 = vrot.slane %v1460_v38, 1  ;;  %v260_v49 = vrot.slane %v1462_v39, 1  ;;  %v244_v53 = vsel %vm241_vm3, %v242_v41, %v243_v42  ;;  %v253_v54 = vsel %vm241_vm3, 0.0, %v242_v41  ;;  %v1306_v8 = vld [vmem:[%s1635_s3 + $0x28] sm:$0xff]   ;;  %v1307_v10 = vld [vmem:[%s1635_s3 + $0x60] sm:$0xff]   ;;  %v1313_v16 = vld [vmem:[%s1635_s3 + $0x50] sm:$0xff]  }
  0x18   : > { %v257_v52 = vsel %vm254_vm2, %v255_v43, %v256_v44  ;;  %v245_v56 = vrot.slane %v1460_v38, 7  ;;  %v1088_v62 = vpack.c.bf16 %v244_v53, %v253_v54  ;;  %v247_v0 = vrot.slane %v1462_v39, 7  ;;  %v1309_v12 = vld [vmem:[%s1635_s3 + $0x20] sm:$0xff]   ;;  %v1317_v20 = vld [vmem:[%s1635_s3 + $0x98] sm:$0xff]   ;;  %v1318_v21 = vld [vmem:[%s1635_s3 + $0x8] sm:$0xff]  }
  0x19   : > { %v259_v57 = vsel %vm254_vm2, %v256_v44, %v258_v47  ;;  %v261_v58 = vsel %vm254_vm2, %v258_v47, %v260_v49  ;;  %v266_v59 = vsel %vm254_vm2, %v260_v49, 0.0  ;;  %v1320_v23 = vld [vmem:[%s1635_s3 + $0x90] sm:$0xff]   ;;  %v1322_v25 = vld [vmem:[%s1635_s3 + $0x88] sm:$0xff]   ;;  %v1061_v30 = vld [vmem:[%s1634_s2] ss:$0 sm:$0xff] }
  0x1a   : > { %1156 = vmatpush3.bf16.msra.mxu0 %v1285_v13  ;;  %1232 = vmatpush3.bf16.msra.mxu1 %v1284_v11  ;;  %v1096_v61 = vpack.c.bf16 %v259_v57, %v257_v52  ;;  %v1100_v63 = vpack.c.bf16 %v266_v59, %v261_v58  ;;  %v246_v6 = vsel %vm241_vm3, %v243_v42, %v245_v56  ;;  %v1308_v11 = vld [vmem:[%s1635_s3 + $0xb0] sm:$0xff]   ;;  %v1310_v13 = vld [vmem:[%s1635_s3 + $0x58] sm:$0xff]  }
  0x1b   : > { %1157 = vmatprep.subr.bf16.mxu0 %v1286_v14  ;;  %1233 = vmatprep.subr.bf16.mxu1 %v1287_v15  ;;  %v248_v7 = vsel %vm241_vm3, %v245_v56, %v247_v0  ;;  %v1311_v14 = vld [vmem:[%s1635_s3 + $0xa8] sm:$0xff]  }
  0x1c   : > { %1241 = vmatprep.mubr.msk.bf16.mxu1 %vm1475_vm6, %v1096_v61  ;;  %v1092_v9 = vpack.c.bf16 %v248_v7, %v246_v6 }
  0x1e   : > { %1158 = vmatpush3.bf16.msra.mxu0 %v1288_v17  ;;  %1234 = vmatpush3.bf16.msra.mxu1 %v1287_v15  ;;  %v1312_v15 = vld [vmem:[%s1635_s3 + $0x18] sm:$0xff]   ;;  %v1314_v17 = vld [vmem:[%s1635_s3 + $0xa0] sm:$0xff]  }
  0x1f   : > { %1159 = vmatprep.subr.bf16.mxu0 %v1289_v18  ;;  %1235 = vmatprep.subr.bf16.mxu1 %v1290_v19  ;;  %v1315_v18 = vld [vmem:[%s1635_s3 + $0x10] sm:$0xff]  }
  0x22   : > { %1160 = vmatpush3.bf16.msra.mxu0 %v1291_v22  ;;  %1236 = vmatpush3.bf16.msra.mxu1 %v1290_v19  ;;  %v1316_v19 = vld [vmem:[%s1635_s3 + $0x48] sm:$0xff]   ;;  %v1319_v22 = vld [vmem:[%s1635_s3 + $0x40] sm:$0xff]  }
  0x23   : > { %1161 = vmatprep.subr.bf16.mxu0 %v1292_v24  ;;  %1237 = vmatprep.subr.bf16.mxu1 %v1293_v26  ;;  %v1321_v24 = vld [vmem:[%s1635_s3] sm:$0xff]  }
  0x26   : > { %1162 = vmatpush3.bf16.msra.mxu0 %v1294_v28  ;;  %1238 = vmatpush3.bf16.msra.mxu1 %v1293_v26  ;;  %v1323_v26 = vld [vmem:[%s1635_s3 + $0x80] sm:$0xff]  }
  0x27   : > { %1163 = vmatprep.subr.bf16.mxu0 %v1295_v29  ;;  %1239 = vmatprep.subr.bf16.mxu1 %v1296_v35 }
  0x2a   : > { %1164 = vmatpush3.bf16.msra.mxu0 %v1297_v46  ;;  %1240 = vmatpush3.bf16.msra.mxu1 %v1296_v35 }
  0x2b   : > { %1187 = vmatprep.subr.bf16.mxu0 %v1300_v51  ;;  %1245 = vmatprep.subr.bf16.mxu1 %v1305_v2 }
  0x2d   : > { %1089 = vmatmul.mubr.msk.bf16.vlgmr.msra.gmra.mxu0 %vm1486_vm7, %v1088_v62  ;;  %1242 = vmatmul.mubr.msk.bf16.vlgmr.msra.gmra.mxu1 %vm1504_vm9, %v1100_v63 }
  0x2e   : > { %581 = vmatprep.mubr.bf16.mxu0 %v231_v31  ;;  %1188 = vmatpush3.bf16.msra.mxu0 %v1301_v60 }
  0x2f   : > { %1189 = vmatprep.subr.bf16.mxu0 %v1302_v3  ;;  %1246 = vmatpush3.bf16.msra.mxu1 %v1305_v2 }
  0x30   : > { %1247 = vmatprep.subr.bf16.mxu1 %v1308_v11 }
  0x32   : > { %1190 = vmatpush3.bf16.msra.mxu0 %v1303_v4 }
  0x33   : > { %1191 = vmatprep.subr.bf16.mxu0 %v1304_v5  ;;  %1248 = vmatpush3.bf16.msra.mxu1 %v1308_v11 }
  0x34   : > { %1249 = vmatprep.subr.bf16.mxu1 %v1311_v14 }
  0x35   : > { %1093 = vmatmul.mubr.msk.bf16.gmra.mxu0 %vm1519_vm10, %v1092_v9 }
  0x36   : > { %1192 = vmatpush3.bf16.msra.mxu0 %v1306_v8 }
  0x37   : > { %1193 = vmatprep.subr.bf16.mxu0 %v1307_v10  ;;  %1250 = vmatpush3.bf16.msra.mxu1 %v1311_v14 }
  0x38   : > { %1251 = vmatprep.subr.bf16.mxu1 %v1314_v17 }
  0x3a   : > { %1194 = vmatpush3.bf16.msra.mxu0 %v1309_v12 }
  0x3b   : > { %1195 = vmatprep.subr.bf16.mxu0 %v1310_v13  ;;  %1252 = vmatpush3.bf16.msra.mxu1 %v1314_v17 }
  0x3c   : > { %1253 = vmatprep.subr.bf16.mxu1 %v1317_v20 }
  0x3e   : > { %1196 = vmatpush3.bf16.msra.mxu0 %v1312_v15 }
  0x3f   : > { %1197 = vmatprep.subr.bf16.mxu0 %v1313_v16  ;;  %1254 = vmatpush3.bf16.msra.mxu1 %v1317_v20 }
  0x40   : > { %1255 = vmatprep.subr.bf16.mxu1 %v1320_v23 }
  0x42   : > { %1198 = vmatpush3.bf16.msra.mxu0 %v1315_v18 }
  0x43   : > { %1199 = vmatprep.subr.bf16.mxu0 %v1316_v19  ;;  %1256 = vmatpush3.bf16.msra.mxu1 %v1320_v23 }
  0x44   : > { %1257 = vmatprep.subr.bf16.mxu1 %v1322_v25 }
  0x46   : > { %1200 = vmatpush3.bf16.msra.mxu0 %v1318_v21 }
  0x47   : > { %1201 = vmatprep.subr.bf16.mxu0 %v1319_v22  ;;  %1258 = vmatpush3.bf16.msra.mxu1 %v1322_v25  ;;  %v1102_v25 = vld [vmem:[%s1636_s4] ss:$0 sm:$0xff] }
  0x48   : > { %1259 = vmatprep.subr.bf16.mxu1 %v1323_v26 }
  0x4a   : > { %1202 = vmatpush3.bf16.msra.mxu0 %v1321_v24 }
  0x4b   : > { %1260 = vmatpush3.bf16.msra.mxu1 %v1323_v26 }
  0xed   : > { %v1165_v27 = vpop.f32.mrf.mxu0  ;;  %v1243_v28 = vpop.f32.mrf.mxu1 }
  0xef   : > { %v1166_v29 = vpop.f32.mrf.mxu0  ;;  %v624_v31 = vpop.f32.mrf.mxu1 }
  0xf0   : > { %v1167_v32 = vadd.f32 %v1166_v29, %v1165_v27 }
  0xf1   : > { %v1168_v33 = vpop.f32.mrf.mxu0  ;;  %v1244_v35 = vpop.f32.mrf.mxu1 }
  0xf2   : > { %v576_v34 = vadd.f32 %v1167_v32, %v1061_v30 }
  0xf3   : > { %v1169_v40 = vpop.f32.mrf.mxu0  ;;  %v627_v47 = vpop.f32.mrf.mxu1 }
  0xf4   : > { %v625_v41 = vadd.f32 %v624_v31, %v576_v34  ;;  %v1170_v42 = vadd.f32 %v1169_v40, %v1168_v33 }
  0xf5   : > { %v1171_v43 = vpop.f32.mrf.mxu0 }
  0xf6   : > { %v639_v44 = vmax.f32 %v625_v41, 0.0  ;;  %v579_v46 = vadd.f32 %v1170_v42, %v1061_v30 }
  0xf7   : > { %v1172_v49 = vpop.f32.mrf.mxu0 }
  0xf8   : > { %v628_v50 = vadd.f32 %v627_v47, %v579_v46  ;;  %v1173_v51 = vadd.f32 %v1172_v49, %v1171_v43  ;;  %v647_v52 = vrot.slane %v639_v44, 7  ;;  %v659_v5 = vrot.slane %v639_v44, 1 }
  0xf9   : > { %v1174_v53 = vpop.f32.mrf.mxu0 }
  0xfa   : > { %v640_v54 = vmax.f32 %v628_v50, 0.0  ;;  %v584_v56 = vadd.f32 %v1173_v51, %v1061_v30  ;;  %v658_v61 = vsel %vm241_vm3, 0.0, %v647_v52 }
  0xfb   : > { %v1175_v57 = vpop.f32.mrf.mxu0 }
  0xfc   : > { %v648_v58 = vrot.slane %v640_v54, 7  ;;  %v633_v59 = vadd.f32 %v1243_v28, %v584_v56  ;;  %v1176_v60 = vadd.f32 %v1175_v57, %v1174_v53  ;;  %v680_v62 = vpack.c.bf16 %v640_v54, %v639_v44 }
  0xfd   : > { %v660_v0 = vrot.slane %v640_v54, 1 }
  0xfe   : > { %v649_v63 = vsel %vm241_vm3, %v647_v52, %v648_v58  ;;  %v641_v2 = vmax.f32 %v633_v59, 0.0  ;;  %v587_v3 = vadd.f32 %v1176_v60, %v1061_v30  ;;  %916 = vmatprep.mubr.bf16.mxu0 %v680_v62 }
  0xff   : > { %v1129_v4 = vpack.c.bf16 %v649_v63, %v658_v61  ;;  %v661_v10 = vsel %vm254_vm2, %v659_v5, %v660_v0 }
 0x100   : > { %v662_v6 = vrot.slane %v641_v2, 1  ;;  %v636_v7 = vadd.f32 %v1244_v35, %v587_v3  ;;  %v650_v8 = vrot.slane %v641_v2, 7 }
 0x101   : > { %1130 = vmatmul.mubr.msk.bf16.vlgmr.msra.gmra.mxu0 %vm1486_vm7, %v1129_v4 }
 0x102   : > { %v642_v9 = vmax.f32 %v636_v7, 0.0  ;;  %v663_v11 = vsel %vm254_vm2, %v660_v0, %v662_v6  ;;  %v651_v17 = vsel %vm241_vm3, %v648_v58, %v650_v8 }
 0x103   : > { %v1137_v12 = vpack.c.bf16 %v663_v11, %v661_v10 }
 0x104   : > { %v652_v13 = vrot.slane %v642_v9, 7  ;;  %v664_v14 = vrot.slane %v642_v9, 1  ;;  %v683_v15 = vpack.c.bf16 %v642_v9, %v641_v2 }
 0x105   : > { %1261 = vmatprep.mubr.msk.bf16.mxu1 %vm1475_vm6, %v1137_v12 }
 0x106   : > { %v670_v16 = vsel %vm254_vm2, %v664_v14, 0.0  ;;  %924 = vmatprep.mubr.bf16.mxu0 %v683_v15  ;;  %v653_v48 = vsel %vm241_vm3, %v650_v8, %v652_v13  ;;  %v665_v18 = vsel %vm254_vm2, %v662_v6, %v664_v14 }
 0x107   : > { %v1133_v19 = vpack.c.bf16 %v653_v48, %v651_v17  ;;  %v1141_v20 = vpack.c.bf16 %v670_v16, %v665_v18 }
 0x109   : > { %1134 = vmatmul.mubr.msk.bf16.gmra.mxu0 %vm1519_vm10, %v1133_v19  ;;  %1262 = vmatmul.mubr.msk.bf16.vlgmr.msra.gmra.mxu1 %vm1504_vm9, %v1141_v20 }
 0x1c1   : > { %v1203_v45 = vpop.f32.mrf.mxu0 }
 0x1c3   : > { %v1204_v21 = vpop.f32.mrf.mxu0 }
 0x1c4   : > { %v1205_v23 = vadd.f32 %v1204_v21, %v1203_v45 }
 0x1c5   : > { %v1206_v22 = vpop.f32.mrf.mxu0 }
 0x1c6   : > { %v919_v29 = vadd.f32 %v1205_v23, %v1102_v25 }
 0x1c7   : > { %v1207_v24 = vpop.f32.mrf.mxu0 }
 0x1c8   : > { %v1208_v28 = vadd.f32 %v1207_v24, %v1206_v22 }
 0x1c9   : > { %v1209_v26 = vpop.f32.mrf.mxu0  ;;  %v1263_v27 = vpop.f32.mrf.mxu1 }
 0x1ca   : > { %v922_v40 = vadd.f32 %v1208_v28, %v1102_v25 }
 0x1cb   : > { %v1210_v30 = vpop.f32.mrf.mxu0  ;;  %v967_v1 = vpop.f32.mrf.mxu1 }
 0x1cc   : > { %v1211_v31 = vadd.f32 %v1210_v30, %v1209_v26  ;;  %v968_v32 = vadd.f32 %v967_v1, %v919_v29 }
 0x1cd   : > { %v1212_v55 = vpop.f32.mrf.mxu0  ;;  %v1264_v33 = vpop.f32.mrf.mxu1 }
 0x1ce   : > { %v927_v34 = vadd.f32 %v1211_v31, %v1102_v25  ;;  %v982_v35 = vadd.f32 %v968_v32, %v1456_v36 }
 0x1cf   : > { %v1213_v41 = vpop.f32.mrf.mxu0  ;;  %v970_v42 = vpop.f32.mrf.mxu1 }
 0x1d0   : > { %v976_v43 = vadd.f32 %v1263_v27, %v927_v34  ;;  %v986_v44 = vmax.f32 %v982_v35, 0.0  ;;  %v1214_v46 = vadd.f32 %v1213_v41, %v1212_v55  ;;  %v971_v47 = vadd.f32 %v970_v42, %v922_v40 }
 0x1d2   : > { %v984_v49 = vadd.f32 %v976_v43, %v1460_v38  ;;  %990 = vst [vmem:[%s226_s11] sm:$0xff] %v986_v44  ;;  %v930_v50 = vadd.f32 %v1214_v46, %v1102_v25  ;;  %v983_v51 = vadd.f32 %v971_v47, %v1458_v37 }
 0x1d4   : > { %v988_v52 = vmax.f32 %v984_v49, 0.0  ;;  %v979_v53 = vadd.f32 %v1264_v33, %v930_v50  ;;  %v987_v36 = vmax.f32 %v983_v51, 0.0 }
 0x1d6   : > { %v985_v54 = vadd.f32 %v979_v53, %v1462_v39  ;;  %991 = vst [vmem:[%s226_s11 + $0x8] sm:$0xff] %v987_v36  ;;  %992 = vst [vmem:[%s226_s11 + $0x10] sm:$0xff] %v988_v52 }
 0x1d8   : > { %v989_v56 = vmax.f32 %v985_v54, 0.0 }
 0x1da   : > { %993 = vst [vmem:[%s226_s11 + $0x18] sm:$0xff] %v989_v56 }
 0x1db PF: > { %s15_s18 = sadd.s32 1, %s1332_s18  }
 0x1dc   : > { %p12_p4 = scmp.ge.s32.totalorder %s15_s18, 4  }
 0x1de   :  { %14 = sbr.rel (!%p12_p4) target bundleno = 1 (0x1), region = 70 }

</bundles_post_ra>
